<compile_context>
chip_gen: v5e
topology: v5e:2x2
jax: 0.10.0
libtpu: 0.0.40
codegen_flags: <defaults>
</compile_context>

<pallas_src>
import functools
import math

import numpy as np

import jax
import jax.numpy as jnp
from jax import lax
from jax.experimental import pallas as pl
from jax.experimental.pallas import tpu as pltpu


def _round_up(x, n):
    return ((x + n - 1) // n) * n


def bilstm_classifier_kernel(
    T, TC, BB,          # compile-time constants (bound via functools.partial)
    emb_ref,            # (T*BB, 2D)  time-major rows: [emb[t] | emb[T-1-t]]
    w_ih_ref,           # (2D, G)     packed input weights (fwd rows | bwd rows)
    w_hh_ref,           # (S, G)      block-diagonal recurrent weights (fwd|bwd)
    b_ref,              # (1, G)      folded biases (b_ih + b_hh), both dirs
    w_out_ref,          # (S, C)      output linear weight (rows: fwd|bwd)
    b_out_ref,          # (1, C)      output linear bias
    out_ref,            # (BB, C)     logits for this batch block
):
    G = w_ih_ref.shape[1]       # 4 gate blocks
    S = w_hh_ref.shape[0]       # combined state width = 2*H = one gate block

    # Weights / bias loaded once; resident across the whole recurrence.
    w_ih = w_ih_ref[...]
    w_hh = w_hh_ref[...]
    # Hoisted broadcast (JAX does not CSE broadcast_in_dim inside the loop).
    bias = jnp.broadcast_to(b_ref[...], (TC * BB, G)).astype(jnp.float32)
    # TODO(synk): if the bundle dump shows the constant w_hh RHS being re-pushed
    # through the MXU every timestep, switch the recurrent matmul to
    # pltpu.matmul_push_rhs (once, before the loop) + matmul_acc_lhs/matmul_pop.

    def chunk_body(c, carry):
        h, cs, m = carry
        r0 = pl.multiple_of(c * (TC * BB), TC * BB)
        # Chunked hoisted input projection: one MXU matmul covers TC timesteps
        # of BOTH directions; fwd/bwd pre-activations land in disjoint columns,
        # already time-aligned (fwd uses emb[t], bwd uses emb[T-1-t]).
        x = emb_ref[pl.ds(r0, TC * BB), :]                           # (TC*BB, 2D)
        gx = jnp.dot(x, w_ih, preferred_element_type=jnp.float32) + bias
        # Small static unroll inside the fori_loop: LLO scheduler visibility
        # without full-T unroll vreg pressure.
        for tl in range(TC):
            g = gx[tl * BB:(tl + 1) * BB, :] + jnp.dot(
                h, w_hh, preferred_element_type=jnp.float32)
            # PyTorch gate order i, f, g, o; each gate block is S lanes wide,
            # laid out [fwd H | bwd H] (dense packing, no per-gate lane pad).
            i_g = jax.nn.sigmoid(g[:, 0 * S:1 * S])
            f_g = jax.nn.sigmoid(g[:, 1 * S:2 * S])
            g_g = jnp.tanh(g[:, 2 * S:3 * S])
            o_g = jax.nn.sigmoid(g[:, 3 * S:4 * S])
            cs = f_g * cs + i_g * g_g
            h = o_g * jnp.tanh(cs)
            m = jnp.maximum(m, h)
        return h, cs, m

    h0 = jnp.zeros((BB, S), jnp.float32)
    c0 = jnp.zeros((BB, S), jnp.float32)
    m0 = jnp.full((BB, S), -jnp.inf, jnp.float32)   # T >= 1 asserted in wrapper
    _, _, m = lax.fori_loop(0, T // TC, chunk_body, (h0, c0, m0))

    # max-over-time of concat(h_f, h_b) == the lane-concatenated running max;
    # final Linear.  (C is tiny -> masked partial store; acceptable.)
    out_ref[...] = (
        jnp.dot(m, w_out_ref[...], preferred_element_type=jnp.float32)
        + b_out_ref[...]
    ).astype(out_ref.dtype)


def pack_params(params):
    """Pack per-direction LSTM weights into the dense fused layout.

    Gate block width = S = 2*H; within a gate block: [forward H | backward H].
    G = 4*S (gate order i, f, g, o).  The packed input weight has 2*D rows:
    rows [0:D] carry the forward direction (multiplied by emb[t]), rows [D:2D]
    carry the backward direction (multiplied by emb[T-1-t] -- the wrapper
    concatenates emb with its time-reversed copy along D).  The recurrent
    weight is block-diagonal across the fwd/bwd halves of the state so one
    matmul per step serves both directions.
    """
    w_ih_f = np.asarray(params["w_ih_f"], np.float32)
    w_hh_f = np.asarray(params["w_hh_f"], np.float32)
    b_f = np.asarray(params["b_f"], np.float32)
    w_ih_b = np.asarray(params["w_ih_b"], np.float32)
    w_hh_b = np.asarray(params["w_hh_b"], np.float32)
    b_b = np.asarray(params["b_b"], np.float32)
    w_out_f = np.asarray(params["w_out_f"], np.float32)
    w_out_b = np.asarray(params["w_out_b"], np.float32)
    b_out = np.asarray(params["b_out"], np.float32)

    D, fourH = w_ih_f.shape
    H = fourH // 4
    S = 2 * H                      # combined state width / gate block width
    G = 4 * S

    w_ih = np.zeros((2 * D, G), np.float32)
    bias = np.zeros((1, G), np.float32)
    w_hh = np.zeros((S, G), np.float32)
    for k in range(4):             # gate order i, f, g, o
        col = k * S
        sl = slice(k * H, (k + 1) * H)
        # forward direction -> first half of the gate block
        w_ih[0:D, col:col + H] = w_ih_f[:, sl]
        bias[0, col:col + H] = b_f[0, sl]
        w_hh[0:H, col:col + H] = w_hh_f[:, sl]
        # backward direction -> second half of the gate block
        w_ih[D:2 * D, col + H:col + S] = w_ih_b[:, sl]
        bias[0, col + H:col + S] = b_b[0, sl]
        w_hh[H:S, col + H:col + S] = w_hh_b[:, sl]

    w_out = np.concatenate([w_out_f, w_out_b], axis=0)   # (S, C)

    return {
        "w_ih": jnp.asarray(w_ih),
        "w_hh": jnp.asarray(w_hh),
        "b": jnp.asarray(bias),
        "w_out": jnp.asarray(w_out),
        "b_out": jnp.asarray(b_out),
    }


def model_forward(input_ids, params, packed=None, proj_dtype=jnp.float32):
    """input_ids: (T, B) int32 word ids.  Returns (B, nclasses) logits.

    proj_dtype=jnp.bfloat16 casts the hoisted-projection operands (emb, w_ih)
    to bf16 for the MXU (recommended on v6e/v7x) while keeping f32
    accumulation and an all-f32 recurrence; off by default so the strict
    1e-4 check against the f32 reference is safe.
    """
    if packed is None:
        packed = pack_params(params)

    emb_table = params["embedding"]                 # (V, D)
    T, B = input_ids.shape
    assert T >= 1
    D = emb_table.shape[1]
    # Embedding gather (Dropout is identity in eval mode).
    # TODO(synk): for large T*B*D, move the gather into the kernel via
    # PrefetchScalarGridSpec + pl.Element row gather (or manual DMA gather)
    # instead of materializing the (T, B, D) activation in HBM first.
    emb = jnp.take(emb_table, input_ids, axis=0)    # (T, B, D)

    BB = 8                                          # batch block (sublane granule)
    Bp = max(BB, _round_up(B, BB))
    NB = Bp // BB
    if Bp != B:
        emb = jnp.pad(emb, ((0, 0), (0, Bp - B), (0, 0)))

    # Pre-combine the two directions: row t = [emb[t] | emb[T-1-t]] so one
    # matmul against the block-structured w_ih yields both directions' gate
    # pre-activations for fused step t, already in disjoint columns.
    emb_cat = jnp.concatenate([emb, emb[::-1]], axis=-1)            # (T, Bp, 2D)
    twoD = 2 * D
    # Batch-block-major layout so the grid can slice batch without in-kernel
    # reshapes: (NB, T*BB, 2D); rows within a block are time-major.
    emb_packed = (emb_cat.reshape(T, NB, BB, twoD)
                  .transpose(1, 0, 2, 3)
                  .reshape(NB, T * BB, twoD))

    w_ih, w_hh = packed["w_ih"], packed["w_hh"]
    b_p, w_out, b_out = packed["b"], packed["w_out"], packed["b_out"]
    if proj_dtype != jnp.float32:
        emb_packed = emb_packed.astype(proj_dtype)
        w_ih = w_ih.astype(proj_dtype)

    G = w_ih.shape[1]
    S = w_hh.shape[0]
    C = b_out.shape[-1]
    TC = max(c for c in (4, 2, 1) if T % c == 0)    # time chunk / unroll factor

    # TODO(synk): for very long T on v7x (64 MiB VMEM), additionally stream the
    # (T*BB, 2D) emb block in time slabs via pltpu.emit_pipeline instead of
    # keeping it fully resident per batch block.

    flops = (2 * T * Bp * twoD * G          # chunked input projection
             + 2 * T * Bp * S * G           # recurrent matmuls
             + 2 * Bp * S * C)              # output linear
    transcendentals = 5 * T * Bp * S        # 3x sigmoid + 2x tanh per step
    bytes_accessed = (emb_packed.size * emb_packed.dtype.itemsize
                      + w_ih.size * w_ih.dtype.itemsize
                      + 4 * (w_hh.size + b_p.size + w_out.size + b_out.size
                             + Bp * C))

    emb_block_bytes = T * BB * twoD * emb_packed.dtype.itemsize
    weight_bytes = (w_ih.size * w_ih.dtype.itemsize
                    + 4 * (w_hh.size + b_p.size + w_out.size + b_out.size))
    out_block_bytes = BB * C * 4
    vmem_needed = (2 * emb_block_bytes + 2 * weight_bytes + 2 * out_block_bytes
                   + 4 * (1 << 20))          # headroom for chunk temporaries
    vmem_limit = int(min(100 << 20, max(8 << 20, vmem_needed)))

    kernel = functools.partial(bilstm_classifier_kernel, T, TC, BB)
    out = pl.pallas_call(
        kernel,
        out_shape=jax.ShapeDtypeStruct((Bp, C), jnp.float32),
        grid=(NB,),
        in_specs=[
            pl.BlockSpec((None, T * BB, twoD), lambda b: (b, 0, 0)),
            pl.BlockSpec((twoD, G), lambda b: (0, 0)),
            pl.BlockSpec((S, G), lambda b: (0, 0)),
            pl.BlockSpec((1, G), lambda b: (0, 0)),
            pl.BlockSpec((S, C), lambda b: (0, 0)),
            pl.BlockSpec((1, C), lambda b: (0, 0)),
        ],
        out_specs=pl.BlockSpec((BB, C), lambda b: (b, 0)),
        compiler_params=pltpu.CompilerParams(
            dimension_semantics=("parallel",),      # batch blocks -> v7x 2 TCs
            vmem_limit_bytes=vmem_limit),
        cost_estimate=pl.CostEstimate(
            flops=int(flops),
            transcendentals=int(transcendentals),
            bytes_accessed=int(bytes_accessed)),
    )(emb_packed, w_ih, w_hh, b_p, w_out, b_out)
    return out[:B]


def make_params(key, vocab_size, emb_dim, hidden_size, nclasses):
    """Deterministic parameter init mirroring PyTorch shapes.

    hidden_size is the *total* hidden size; each LSTM direction uses
    hidden_size // 2 units (nn.LSTM(n_d, hidden//2, bidirectional=True));
    the output Linear maps hidden_size -> nclasses.
    """
    H = hidden_size // 2
    keys = jax.random.split(key, 12)
    k = 1.0 / math.sqrt(H)

    def u(kk, shape, bound):
        return jax.random.uniform(kk, shape, jnp.float32, -bound, bound)

    params = {
        "embedding": jax.random.normal(keys[0], (vocab_size, emb_dim), jnp.float32) * 0.1,
        # forward direction (gate order i,f,g,o packed along last axis)
        "w_ih_f": u(keys[1], (emb_dim, 4 * H), k),
        "w_hh_f": u(keys[2], (H, 4 * H), k),
        "b_f":    u(keys[3], (1, 4 * H), k) + u(keys[4], (1, 4 * H), k),  # b_ih + b_hh
        # backward direction
        "w_ih_b": u(keys[5], (emb_dim, 4 * H), k),
        "w_hh_b": u(keys[6], (H, 4 * H), k),
        "b_b":    u(keys[7], (1, 4 * H), k) + u(keys[8], (1, 4 * H), k),
        # output linear: weight (2H, C) split into fwd/bwd halves
        "w_out_f": u(keys[9], (H, nclasses), 1.0 / math.sqrt(2 * H)),
        "w_out_b": u(keys[10], (H, nclasses), 1.0 / math.sqrt(2 * H)),
        "b_out":   u(keys[11], (1, nclasses), 1.0 / math.sqrt(2 * H)),
    }
    return params


def model_forward_ref(input_ids, params):
    """Pure-JAX reference (same math) for a sanity check."""
    emb = jnp.take(params["embedding"], input_ids, axis=0)  # (T, B, D)
    H = params["w_hh_f"].shape[0]
    B = emb.shape[1]

    def run_dir(seq, wih, whh, b):
        def step(carry, x_t):
            h, c = carry
            gates = x_t @ wih + h @ whh + b
            i_g = jax.nn.sigmoid(gates[:, 0 * H:1 * H])
            f_g = jax.nn.sigmoid(gates[:, 1 * H:2 * H])
            g_g = jnp.tanh(gates[:, 2 * H:3 * H])
            o_g = jax.nn.sigmoid(gates[:, 3 * H:4 * H])
            c_new = f_g * c + i_g * g_g
            h_new = o_g * jnp.tanh(c_new)
            return (h_new, c_new), h_new

        init = (jnp.zeros((B, H)), jnp.zeros((B, H)))
        _, hs = lax.scan(step, init, seq)
        return hs  # (T, B, H)

    h_f = run_dir(emb, params["w_ih_f"], params["w_hh_f"], params["b_f"])
    h_b = run_dir(emb[::-1], params["w_ih_b"], params["w_hh_b"], params["b_b"])[::-1]
    out = jnp.concatenate([h_f, h_b], axis=-1)          # (T, B, 2H)
    pooled = jnp.max(out, axis=0)                       # (B, 2H)
    w_out = jnp.concatenate([params["w_out_f"], params["w_out_b"]], axis=0)
    return pooled @ w_out + params["b_out"]


if __name__ == "__main__":
    # Small shapes consistent with the module's forward:
    #   input: (seq_len, batch) int ids ; emb_dim = n_d ; hidden_size = 32
    T, B = 8, 2
    VOCAB, EMB_DIM, HIDDEN, NCLASSES = 100, 32, 32, 2

    key = jax.random.PRNGKey(0)
    k_ids, k_params = jax.random.split(key)
    input_ids = jax.random.randint(k_ids, (T, B), 0, VOCAB, dtype=jnp.int32)
    params = make_params(k_params, VOCAB, EMB_DIM, HIDDEN, NCLASSES)
    packed = pack_params(params)

    logits = model_forward(input_ids, params, packed)
    logits = jax.block_until_ready(logits)

    ref = model_forward_ref(input_ids, params)
    assert logits.shape == (B, NCLASSES)
    assert jnp.allclose(logits, ref, atol=1e-4, rtol=1e-4), (logits, ref)

    print("KERNEL_OK")
</pallas_src>

<mosaic_0001>
module attributes {stable_mosaic.version = 11 : i64} {
  func.func @bilstm_classifier_kernel(%arg0: i32, %arg1: memref<1x64x64xf32, #tpu.memory_space<vmem>>, %arg2: memref<64x128xf32, #tpu.memory_space<vmem>>, %arg3: memref<32x128xf32, #tpu.memory_space<vmem>>, %arg4: memref<1x128xf32, #tpu.memory_space<vmem>>, %arg5: memref<32x2xf32, #tpu.memory_space<vmem>>, %arg6: memref<1x2xf32, #tpu.memory_space<vmem>>, %arg7: memref<8x2xf32, #tpu.memory_space<vmem>>) attributes {dimension_semantics = [#tpu.dimension_semantics<parallel>], iteration_bounds = array<i64: 1>, scalar_prefetch = 0 : i64, scratch_operands = 0 : i64, tpu.core_type = #tpu.core_type<tc>, window_params = [{transform_indices = @transform_0, window_bounds = array<i64: 1, 64, 64>}, {pipeline_mode = #tpu.pipeline_mode<synchronous>, transform_indices = @transform_1, window_bounds = array<i64: 64, 128>}, {pipeline_mode = #tpu.pipeline_mode<synchronous>, transform_indices = @transform_2, window_bounds = array<i64: 32, 128>}, {pipeline_mode = #tpu.pipeline_mode<synchronous>, transform_indices = @transform_3, window_bounds = array<i64: 1, 128>}, {pipeline_mode = #tpu.pipeline_mode<synchronous>, transform_indices = @transform_4, window_bounds = array<i64: 32, 2>}, {pipeline_mode = #tpu.pipeline_mode<synchronous>, transform_indices = @transform_5, window_bounds = array<i64: 1, 2>}, {transform_indices = @transform_6, window_bounds = array<i64: 8, 2>}]} {
    %c0 = arith.constant 0 : index
    %c0_0 = arith.constant 0 : index
    %0 = vector.load %arg2[%c0, %c0_0] : memref<64x128xf32, #tpu.memory_space<vmem>>, vector<64x128xf32>
    %c0_1 = arith.constant 0 : index
    %c0_2 = arith.constant 0 : index
    %1 = vector.load %arg3[%c0_1, %c0_2] : memref<32x128xf32, #tpu.memory_space<vmem>>, vector<32x128xf32>
    %c0_3 = arith.constant 0 : index
    %c0_4 = arith.constant 0 : index
    %2 = vector.load %arg4[%c0_3, %c0_4] : memref<1x128xf32, #tpu.memory_space<vmem>>, vector<1x128xf32>
    %3 = vector.shape_cast %2 : vector<1x128xf32> to vector<1x128xf32>
    %4 = vector.broadcast %3 : vector<1x128xf32> to vector<32x128xf32>
    %cst = arith.constant 0.000000e+00 : f32
    %5 = vector.broadcast %cst : f32 to vector<8x32xf32>
    %cst_5 = arith.constant 0.000000e+00 : f32
    %6 = vector.broadcast %cst_5 : f32 to vector<8x32xf32>
    %cst_6 = arith.constant 0xFF800000 : f32
    %7 = vector.broadcast %cst_6 : f32 to vector<8x32xf32>
    %c0_i32 = arith.constant 0 : i32
    %c2_i32 = arith.constant 2 : i32
    %8 = arith.addi %c0_i32, %c2_i32 : i32
    %c1_i32 = arith.constant 1 : i32
    %9:3 = scf.for %arg8 = %c0_i32 to %8 step %c1_i32 iter_args(%arg9 = %5, %arg10 = %6, %arg11 = %7) -> (vector<8x32xf32>, vector<8x32xf32>, vector<8x32xf32>)  : i32 {
      %c32_i32 = arith.constant 32 : i32
      %16 = arith.muli %arg8, %c32_i32 : i32
      %17 = tpu.assume_multiple %16, 32 : i32
      %c0_15 = arith.constant 0 : index
      %18 = arith.index_cast %17 : i32 to index
      %c0_16 = arith.constant 0 : index
      %19 = vector.load %arg1[%c0_15, %18, %c0_16] : memref<1x64x64xf32, #tpu.memory_space<vmem>>, vector<1x32x64xf32>
      %20 = vector.shape_cast %19 : vector<1x32x64xf32> to vector<32x64xf32>
      %cst_17 = arith.constant dense<0.000000e+00> : vector<32x128xf32>
      %21 = tpu.matmul %20, %0, %cst_17 {dimension_numbers = #tpu.dot_dimension_numbers<[1], [0], [0], [1], [0, 0, 1, 1], [], []>} : vector<32x64xf32>, vector<64x128xf32>, vector<32x128xf32> -> vector<32x128xf32>
      %22 = arith.addf %21, %4 : vector<32x128xf32>
      %23 = vector.extract_strided_slice %22 {offsets = [0, 0], sizes = [8, 128], strides = [1, 1]} : vector<32x128xf32> to vector<8x128xf32>
      %cst_18 = arith.constant dense<0.000000e+00> : vector<8x128xf32>
      %24 = tpu.matmul %arg9, %1, %cst_18 {dimension_numbers = #tpu.dot_dimension_numbers<[1], [0], [0], [1], [0, 0, 1, 1], [], []>} : vector<8x32xf32>, vector<32x128xf32>, vector<8x128xf32> -> vector<8x128xf32>
      %25 = arith.addf %23, %24 : vector<8x128xf32>
      %26 = vector.extract_strided_slice %25 {offsets = [0, 0], sizes = [8, 32], strides = [1, 1]} : vector<8x128xf32> to vector<8x32xf32>
      %27 = arith.negf %26 : vector<8x32xf32>
      %28 = math.exp %27 : vector<8x32xf32>
      %cst_19 = arith.constant 1.000000e+00 : f32
      %29 = vector.broadcast %cst_19 : f32 to vector<8x32xf32>
      %30 = arith.addf %29, %28 : vector<8x32xf32>
      %31 = arith.divf %29, %30 : vector<8x32xf32>
      %32 = vector.extract_strided_slice %25 {offsets = [0, 32], sizes = [8, 32], strides = [1, 1]} : vector<8x128xf32> to vector<8x32xf32>
      %33 = arith.negf %32 : vector<8x32xf32>
      %34 = math.exp %33 : vector<8x32xf32>
      %cst_20 = arith.constant 1.000000e+00 : f32
      %35 = vector.broadcast %cst_20 : f32 to vector<8x32xf32>
      %36 = arith.addf %35, %34 : vector<8x32xf32>
      %37 = arith.divf %35, %36 : vector<8x32xf32>
      %38 = vector.extract_strided_slice %25 {offsets = [0, 64], sizes = [8, 32], strides = [1, 1]} : vector<8x128xf32> to vector<8x32xf32>
      %39 = math.tanh %38 : vector<8x32xf32>
      %40 = vector.extract_strided_slice %25 {offsets = [0, 96], sizes = [8, 32], strides = [1, 1]} : vector<8x128xf32> to vector<8x32xf32>
      %41 = arith.negf %40 : vector<8x32xf32>
      %42 = math.exp %41 : vector<8x32xf32>
      %cst_21 = arith.constant 1.000000e+00 : f32
      %43 = vector.broadcast %cst_21 : f32 to vector<8x32xf32>
      %44 = arith.addf %43, %42 : vector<8x32xf32>
      %45 = arith.divf %43, %44 : vector<8x32xf32>
      %46 = arith.mulf %37, %arg10 : vector<8x32xf32>
      %47 = arith.mulf %31, %39 : vector<8x32xf32>
      %48 = arith.addf %46, %47 : vector<8x32xf32>
      %49 = math.tanh %48 : vector<8x32xf32>
      %50 = arith.mulf %45, %49 : vector<8x32xf32>
      %51 = arith.maximumf %arg11, %50 : vector<8x32xf32>
      %52 = vector.extract_strided_slice %22 {offsets = [8, 0], sizes = [8, 128], strides = [1, 1]} : vector<32x128xf32> to vector<8x128xf32>
      %cst_22 = arith.constant dense<0.000000e+00> : vector<8x128xf32>
      %53 = tpu.matmul %50, %1, %cst_22 {dimension_numbers = #tpu.dot_dimension_numbers<[1], [0], [0], [1], [0, 0, 1, 1], [], []>} : vector<8x32xf32>, vector<32x128xf32>, vector<8x128xf32> -> vector<8x128xf32>
      %54 = arith.addf %52, %53 : vector<8x128xf32>
      %55 = vector.extract_strided_slice %54 {offsets = [0, 0], sizes = [8, 32], strides = [1, 1]} : vector<8x128xf32> to vector<8x32xf32>
      %56 = arith.negf %55 : vector<8x32xf32>
      %57 = math.exp %56 : vector<8x32xf32>
      %cst_23 = arith.constant 1.000000e+00 : f32
      %58 = vector.broadcast %cst_23 : f32 to vector<8x32xf32>
      %59 = arith.addf %58, %57 : vector<8x32xf32>
      %60 = arith.divf %58, %59 : vector<8x32xf32>
      %61 = vector.extract_strided_slice %54 {offsets = [0, 32], sizes = [8, 32], strides = [1, 1]} : vector<8x128xf32> to vector<8x32xf32>
      %62 = arith.negf %61 : vector<8x32xf32>
      %63 = math.exp %62 : vector<8x32xf32>
      %cst_24 = arith.constant 1.000000e+00 : f32
      %64 = vector.broadcast %cst_24 : f32 to vector<8x32xf32>
      %65 = arith.addf %64, %63 : vector<8x32xf32>
      %66 = arith.divf %64, %65 : vector<8x32xf32>
      %67 = vector.extract_strided_slice %54 {offsets = [0, 64], sizes = [8, 32], strides = [1, 1]} : vector<8x128xf32> to vector<8x32xf32>
      %68 = math.tanh %67 : vector<8x32xf32>
      %69 = vector.extract_strided_slice %54 {offsets = [0, 96], sizes = [8, 32], strides = [1, 1]} : vector<8x128xf32> to vector<8x32xf32>
      %70 = arith.negf %69 : vector<8x32xf32>
      %71 = math.exp %70 : vector<8x32xf32>
      %cst_25 = arith.constant 1.000000e+00 : f32
      %72 = vector.broadcast %cst_25 : f32 to vector<8x32xf32>
      %73 = arith.addf %72, %71 : vector<8x32xf32>
      %74 = arith.divf %72, %73 : vector<8x32xf32>
      %75 = arith.mulf %66, %48 : vector<8x32xf32>
      %76 = arith.mulf %60, %68 : vector<8x32xf32>
      %77 = arith.addf %75, %76 : vector<8x32xf32>
      %78 = math.tanh %77 : vector<8x32xf32>
      %79 = arith.mulf %74, %78 : vector<8x32xf32>
      %80 = arith.maximumf %51, %79 : vector<8x32xf32>
      %81 = vector.extract_strided_slice %22 {offsets = [16, 0], sizes = [8, 128], strides = [1, 1]} : vector<32x128xf32> to vector<8x128xf32>
      %cst_26 = arith.constant dense<0.000000e+00> : vector<8x128xf32>
      %82 = tpu.matmul %79, %1, %cst_26 {dimension_numbers = #tpu.dot_dimension_numbers<[1], [0], [0], [1], [0, 0, 1, 1], [], []>} : vector<8x32xf32>, vector<32x128xf32>, vector<8x128xf32> -> vector<8x128xf32>
      %83 = arith.addf %81, %82 : vector<8x128xf32>
      %84 = vector.extract_strided_slice %83 {offsets = [0, 0], sizes = [8, 32], strides = [1, 1]} : vector<8x128xf32> to vector<8x32xf32>
      %85 = arith.negf %84 : vector<8x32xf32>
      %86 = math.exp %85 : vector<8x32xf32>
      %cst_27 = arith.constant 1.000000e+00 : f32
      %87 = vector.broadcast %cst_27 : f32 to vector<8x32xf32>
      %88 = arith.addf %87, %86 : vector<8x32xf32>
      %89 = arith.divf %87, %88 : vector<8x32xf32>
      %90 = vector.extract_strided_slice %83 {offsets = [0, 32], sizes = [8, 32], strides = [1, 1]} : vector<8x128xf32> to vector<8x32xf32>
      %91 = arith.negf %90 : vector<8x32xf32>
      %92 = math.exp %91 : vector<8x32xf32>
      %cst_28 = arith.constant 1.000000e+00 : f32
      %93 = vector.broadcast %cst_28 : f32 to vector<8x32xf32>
      %94 = arith.addf %93, %92 : vector<8x32xf32>
      %95 = arith.divf %93, %94 : vector<8x32xf32>
      %96 = vector.extract_strided_slice %83 {offsets = [0, 64], sizes = [8, 32], strides = [1, 1]} : vector<8x128xf32> to vector<8x32xf32>
      %97 = math.tanh %96 : vector<8x32xf32>
      %98 = vector.extract_strided_slice %83 {offsets = [0, 96], sizes = [8, 32], strides = [1, 1]} : vector<8x128xf32> to vector<8x32xf32>
      %99 = arith.negf %98 : vector<8x32xf32>
      %100 = math.exp %99 : vector<8x32xf32>
      %cst_29 = arith.constant 1.000000e+00 : f32
      %101 = vector.broadcast %cst_29 : f32 to vector<8x32xf32>
      %102 = arith.addf %101, %100 : vector<8x32xf32>
      %103 = arith.divf %101, %102 : vector<8x32xf32>
      %104 = arith.mulf %95, %77 : vector<8x32xf32>
      %105 = arith.mulf %89, %97 : vector<8x32xf32>
      %106 = arith.addf %104, %105 : vector<8x32xf32>
      %107 = math.tanh %106 : vector<8x32xf32>
      %108 = arith.mulf %103, %107 : vector<8x32xf32>
      %109 = arith.maximumf %80, %108 : vector<8x32xf32>
      %110 = vector.extract_strided_slice %22 {offsets = [24, 0], sizes = [8, 128], strides = [1, 1]} : vector<32x128xf32> to vector<8x128xf32>
      %cst_30 = arith.constant dense<0.000000e+00> : vector<8x128xf32>
      %111 = tpu.matmul %108, %1, %cst_30 {dimension_numbers = #tpu.dot_dimension_numbers<[1], [0], [0], [1], [0, 0, 1, 1], [], []>} : vector<8x32xf32>, vector<32x128xf32>, vector<8x128xf32> -> vector<8x128xf32>
      %112 = arith.addf %110, %111 : vector<8x128xf32>
      %113 = vector.extract_strided_slice %112 {offsets = [0, 0], sizes = [8, 32], strides = [1, 1]} : vector<8x128xf32> to vector<8x32xf32>
      %114 = arith.negf %113 : vector<8x32xf32>
      %115 = math.exp %114 : vector<8x32xf32>
      %cst_31 = arith.constant 1.000000e+00 : f32
      %116 = vector.broadcast %cst_31 : f32 to vector<8x32xf32>
      %117 = arith.addf %116, %115 : vector<8x32xf32>
      %118 = arith.divf %116, %117 : vector<8x32xf32>
      %119 = vector.extract_strided_slice %112 {offsets = [0, 32], sizes = [8, 32], strides = [1, 1]} : vector<8x128xf32> to vector<8x32xf32>
      %120 = arith.negf %119 : vector<8x32xf32>
      %121 = math.exp %120 : vector<8x32xf32>
      %cst_32 = arith.constant 1.000000e+00 : f32
      %122 = vector.broadcast %cst_32 : f32 to vector<8x32xf32>
      %123 = arith.addf %122, %121 : vector<8x32xf32>
      %124 = arith.divf %122, %123 : vector<8x32xf32>
      %125 = vector.extract_strided_slice %112 {offsets = [0, 64], sizes = [8, 32], strides = [1, 1]} : vector<8x128xf32> to vector<8x32xf32>
      %126 = math.tanh %125 : vector<8x32xf32>
      %127 = vector.extract_strided_slice %112 {offsets = [0, 96], sizes = [8, 32], strides = [1, 1]} : vector<8x128xf32> to vector<8x32xf32>
      %128 = arith.negf %127 : vector<8x32xf32>
      %129 = math.exp %128 : vector<8x32xf32>
      %cst_33 = arith.constant 1.000000e+00 : f32
      %130 = vector.broadcast %cst_33 : f32 to vector<8x32xf32>
      %131 = arith.addf %130, %129 : vector<8x32xf32>
      %132 = arith.divf %130, %131 : vector<8x32xf32>
      %133 = arith.mulf %124, %106 : vector<8x32xf32>
      %134 = arith.mulf %118, %126 : vector<8x32xf32>
      %135 = arith.addf %133, %134 : vector<8x32xf32>
      %136 = math.tanh %135 : vector<8x32xf32>
      %137 = arith.mulf %132, %136 : vector<8x32xf32>
      %138 = arith.maximumf %109, %137 : vector<8x32xf32>
      scf.yield %137, %135, %138 : vector<8x32xf32>, vector<8x32xf32>, vector<8x32xf32>
    }
    %c2_i32_7 = arith.constant 2 : i32
    %c0_8 = arith.constant 0 : index
    %c0_9 = arith.constant 0 : index
    %10 = vector.load %arg5[%c0_8, %c0_9] : memref<32x2xf32, #tpu.memory_space<vmem>>, vector<32x2xf32>
    %cst_10 = arith.constant dense<0.000000e+00> : vector<8x2xf32>
    %11 = tpu.matmul %9#2, %10, %cst_10 {dimension_numbers = #tpu.dot_dimension_numbers<[1], [0], [0], [1], [0, 0, 1, 1], [], []>} : vector<8x32xf32>, vector<32x2xf32>, vector<8x2xf32> -> vector<8x2xf32>
    %c0_11 = arith.constant 0 : index
    %c0_12 = arith.constant 0 : index
    %12 = vector.load %arg6[%c0_11, %c0_12] : memref<1x2xf32, #tpu.memory_space<vmem>>, vector<1x2xf32>
    %13 = vector.broadcast %12 : vector<1x2xf32> to vector<8x2xf32>
    %14 = arith.addf %11, %13 : vector<8x2xf32>
    %c0_13 = arith.constant 0 : index
    %c0_14 = arith.constant 0 : index
    %15 = vector.load %arg7[%c0_13, %c0_14] : memref<8x2xf32, #tpu.memory_space<vmem>>, vector<8x2xf32>
    tpu.vector_store %arg7[%c0_13, %c0_14], %14 {strides = array<i32>} : memref<8x2xf32, #tpu.memory_space<vmem>>, vector<8x2xf32>,
    return
  }
  func.func @transform_0(%arg0: i32) -> (i32, i32, i32) {
    %c0_i32 = arith.constant 0 : i32
    %c0_i32_0 = arith.constant 0 : i32
    %c0_i32_1 = arith.constant 0 : i32
    return %arg0, %c0_i32, %c0_i32_0 : i32, i32, i32
  }
  func.func @transform_1(%arg0: i32) -> (i32, i32) {
    %c0_i32 = arith.constant 0 : i32
    %c0_i32_0 = arith.constant 0 : i32
    %c0_i32_1 = arith.constant 0 : i32
    return %c0_i32, %c0_i32_0 : i32, i32
  }
  func.func @transform_2(%arg0: i32) -> (i32, i32) {
    %c0_i32 = arith.constant 0 : i32
    %c0_i32_0 = arith.constant 0 : i32
    %c0_i32_1 = arith.constant 0 : i32
    return %c0_i32, %c0_i32_0 : i32, i32
  }
  func.func @transform_3(%arg0: i32) -> (i32, i32) {
    %c0_i32 = arith.constant 0 : i32
    %c0_i32_0 = arith.constant 0 : i32
    %c0_i32_1 = arith.constant 0 : i32
    return %c0_i32, %c0_i32_0 : i32, i32
  }
  func.func @transform_4(%arg0: i32) -> (i32, i32) {
    %c0_i32 = arith.constant 0 : i32
    %c0_i32_0 = arith.constant 0 : i32
    %c0_i32_1 = arith.constant 0 : i32
    return %c0_i32, %c0_i32_0 : i32, i32
  }
  func.func @transform_5(%arg0: i32) -> (i32, i32) {
    %c0_i32 = arith.constant 0 : i32
    %c0_i32_0 = arith.constant 0 : i32
    %c0_i32_1 = arith.constant 0 : i32
    return %c0_i32, %c0_i32_0 : i32, i32
  }
  func.func @transform_6(%arg0: i32) -> (i32, i32) {
    %c0_i32 = arith.constant 0 : i32
    %c0_i32_0 = arith.constant 0 : i32
    return %arg0, %c0_i32 : i32, i32
  }
}

</mosaic_0001>

<bundles_post_ra>
// kernel: tpu_custom_call.1
= control target key start
LH: loop header
LB: loop body
LE: loop exit
PB: predicated region body
PF: predicated region fallthrough
CT: control target
= control target key end

     0   :  { %11 = vsyncpa [#allocation3], 0  ;;  %s845_s0 = inlined_call_operand.hbm [shape: f32[1,64,64], index: 0, kind: input, shape index: {}]   ;;  %s846_s1 = inlined_call_operand.hbm [shape: f32[64,128], index: 1, kind: input, shape index: {}]   ;;  %s847_s2 = inlined_call_operand.vmem [shape: f32[32,128], index: 2, kind: input, shape index: {}]   ;;  %s848_s3 = inlined_call_operand.vmem [shape: f32[1,128], index: 3, kind: input, shape index: {}]   ;;  %s849_s4 = inlined_call_operand.vmem [shape: f32[32,2], index: 4, kind: input, shape index: {}]   ;;  %s850_s5 = inlined_call_operand.vmem [shape: f32[1,2], index: 5, kind: input, shape index: {}]   ;;  %s851_s6 = inlined_call_operand.vmem [shape: f32[8,2], index: 6, kind: output, shape index: {}]  }
   0x1   :  { %s17_s23 = sshll.u32 %s845_s0, 4  ;;  %s18_s23 = int_to_ptr.hbm [resolvable:$true] %s17_s23 }
   0x2   :  { %12 = vsyncpa [#allocation5], 0  ;;  %s630_s24 = smov [#allocation2]   ;;  %s30_s28 = sshll.u32 %s846_s1, 4  ;;  %s31_s28 = int_to_ptr.hbm [resolvable:$true] %s30_s28 }
   0x3   :  { %s19_s25 = sshll.u32 %s630_s24, 4  ;;  %s631_s29 = smov 128   ;;  %s20_s25 = int_to_ptr.vmem [resolvable:$true] %s19_s25 }
   0x4   :  { %s632_s30 = smov 8   ;;  %s633_s7 = smov [#allocation4]  }
   0x5   :  { %25 = dma.hbm_to_vmem [thread:$0]  %s18_s23, 1024, %s20_s25, [#allocation3], %s631_s29, %s631_s29, %s632_s30  }
   0x6   :  { %s32_s8 = sshll.u32 %s633_s7, 4  ;;  %s33_s8 = int_to_ptr.vmem [resolvable:$true] %s32_s8 }
   0x7   :  { %38 = dma.hbm_to_vmem [thread:$0]  %s31_s28, 1024, %s33_s8, [#allocation5], %s631_s29, %s631_s29, %s632_s30  }
   0x8   :  { %610 = dma.done.wait [#allocation3], 1024  }
   0x9   :  { %611 = vsyncadd [#allocation3], 4294966272 }
   0xa   :  { %612 = dma.done.wait [#allocation5], 1024  }
   0xb   :  { %613 = vsyncadd [#allocation5], 4294966272  ;;  %v678_v0 = vld [vmem:[#allocation4] sm:$0xff]  ;;  %v680_v1 = vld [vmem:[#allocation4 + $0x8] sm:$0xff]  ;;  %v719_v13 = vmov -inf   ;;  %v721_v14 = vmov 0.0  }
   0xc   :  { %v682_v2 = vld [vmem:[#allocation4 + $0x10] sm:$0xff]  ;;  %v684_v3 = vld [vmem:[#allocation4 + $0x18] sm:$0xff]  ;;  %v686_v4 = vld [vmem:[#allocation4 + $0x20] sm:$0xff]  ;;  %v723_v15 = vmov 0.0   ;;  %s725_s17 = smov 0  }
   0xd   :  { %v688_v5 = vld [vmem:[#allocation4 + $0x28] sm:$0xff]  ;;  %v690_v6 = vld [vmem:[#allocation4 + $0x30] sm:$0xff]  ;;  %v692_v7 = vld [vmem:[#allocation4 + $0x38] sm:$0xff] }
   0xe   :  { %v697_v8 = vld [vmem:[%s847_s2] sm:$0xff]  ;;  %v702_v9 = vld [vmem:[%s847_s2 + $0x8] sm:$0xff]  ;;  %v707_v10 = vld [vmem:[%s847_s2 + $0x10] sm:$0xff] }
   0xf   :  { %v712_v11 = vld [vmem:[%s847_s2 + $0x18] sm:$0xff]  ;;  %v717_v12 = vld [vmem:[%s848_s3] ss:$0 sm:$0xff] }
  0x10 LB: > { %107 = vmatpush.msra.mxu0 %v692_v7  ;;  %146 = vmatpush.msra.mxu1 %v712_v11  ;;  %s634_s2 = smov 32   ;;  %s443_s3 = sshll.u32 %s628_s17, 5  ;;  %vm86_vm0 = vcmask 523264   ;;  %vm131_vm1 = vcmask 261120   ;;  %s628_s17 = sphi %s725_s17, %s76_s17   ;;  %v624_v15 = vphi %v723_v15, %v383_v15   ;;  %v620_v14 = vphi %v721_v14, %v377_v14   ;;  %v616_v13 = vphi %v719_v13, %v852_v13  }
  0x11   : > { %457 = vmatpush.msra.mxu2 %v692_v7  ;;  %458 = vmatpush.msra.mxu3 %v692_v7  ;;  %s763_s18 = scalar_lea.vmem [#allocation2], %s443_s3  ;;  %s635_s19 = smov 64  }
  0x12   : > { %129 = vrot.lane.b32.xlu0 %v624_v15, %s634_s2  ;;  %108 = vmatpush.msra.mxu0 %v690_v6  ;;  %v82_v16 = vld [vmem:[%s763_s18] sm:$0xff]  ;;  %v84_v42 = vld [vmem:[%s763_s18 + $0x10] sm:$0xff]  ;;  %v83_v45 = vld [vmem:[%s763_s18 + $0x8] sm:$0xff]  ;;  %s76_s17 = sadd.s32 1, %s628_s17  }
  0x13   : > { %147 = vmatpush.msra.mxu1 %v707_v10  ;;  %459 = vmatpush.msra.mxu2 %v690_v6  ;;  %p73_p0 = scmp.ge.s32.totalorder %s76_s17, 2  }
  0x14   : > { %109 = vmatpush.msra.mxu0 %v688_v5  ;;  %460 = vmatpush.msra.mxu3 %v690_v6  ;;  %s636_s24 = smov (%p73_p0), 32  }
  0x15   : > { %148 = vmatpush.msra.mxu1 %v702_v9  ;;  %461 = vmatpush.msra.mxu2 %v688_v5 }
  0x16   : > { %110 = vmatpush.msra.mxu0 %v686_v4  ;;  %462 = vmatpush.msra.mxu3 %v688_v5 }
  0x17   : > { %149 = vmatpush.msra.mxu1 %v697_v8  ;;  %463 = vmatpush.msra.mxu2 %v686_v4 }
  0x18   : > { %111 = vmatpush.msra.mxu0 %v684_v3  ;;  %464 = vmatpush.msra.mxu3 %v686_v4 }
  0x19   : > { %465 = vmatpush.msra.mxu2 %v684_v3  ;;  %338 = vmatpush.msrb.mxu1 %v712_v11 }
  0x1a   : > { %112 = vmatpush.msra.mxu0 %v682_v2  ;;  %466 = vmatpush.msra.mxu3 %v684_v3 }
  0x1b   : > { %467 = vmatpush.msra.mxu2 %v682_v2  ;;  %339 = vmatpush.msrb.mxu1 %v707_v10 }
  0x1c   : > { %113 = vmatpush.msra.mxu0 %v680_v1  ;;  %468 = vmatpush.msra.mxu3 %v682_v2  ;;  %v545_v2 = vld [vmem:[%s850_s5] ss:$0 sm:$0xff] (%p73_p0) }
  0x1d   : > { %469 = vmatpush.msra.mxu2 %v680_v1  ;;  %340 = vmatpush.msrb.mxu1 %v702_v9 }
  0x1e   : > { %114 = vmatpush.msra.mxu0 %v678_v0  ;;  %470 = vmatpush.msra.mxu3 %v680_v1 }
  0x1f   : > { %444 = vmatmul.msk.f32.vlgmr.msra.gmra.mxu0 %vm86_vm0, %v82_v16  ;;  %471 = vmatpush.msra.mxu2 %v678_v0 }
  0x20   : > { %472 = vmatpush.msra.mxu3 %v678_v0  ;;  %341 = vmatpush.msrb.mxu1 %v697_v8  ;;  %v385_v0 = vld [vmem:[%s849_s4] sm:$0xff] (%p73_p0) }
  0x21   : > { %210 = vmatpush.msrb.mxu2 %v712_v11 }
  0x22   : > { %274 = vmatpush.msrb.mxu3 %v712_v11  ;;  %446 = vmatmul.msk.f32.vlgmr.msra.gmra.mxu2 %vm86_vm0, %v84_v42 }
  0x23   : > { %211 = vmatpush.msrb.mxu2 %v707_v10 }
  0x24   : > { %275 = vmatpush.msrb.mxu3 %v707_v10 }
  0x25   : > { %212 = vmatpush.msrb.mxu2 %v702_v9 }
  0x26   : > { %276 = vmatpush.msrb.mxu3 %v702_v9 }
  0x27   : > { %213 = vmatpush.msrb.mxu2 %v697_v8  ;;  %445 = vmatmul.msk.f32.gmra.mxu0 %vm86_vm0, %v83_v45 }
  0x28   : > { %277 = vmatpush.msrb.mxu3 %v697_v8 }
  0x84   : > { %v130_v17 = vpop.permute.xlu0 %129 }
  0x85   : > { %448 = vmatmul.msk.f32.vlgmr.msra.gmra.mxu1 %vm131_vm1, %v130_v17 }
  0x9c   : > { %v116_v18 = vpop.f32.mrf.mxu0 }
  0x9d   : > { %v117_v19 = vadd.f32 %v717_v12, %v116_v18 }
  0xa4   : > { %v119_v48 = vpop.f32.mrf.mxu0 }
  0xa5   : > { %v122_v47 = vpop.f32.mrf.mxu2  ;;  %v120_v49 = vadd.f32 %v717_v12, %v119_v48 }
 0x102   : > { %v151_v20 = vpop.f32.mrf.mxu1 }
 0x103   : > { %v154_v21 = vadd.f32 %v151_v20, %v117_v19 }
 0x105   : > { %513 = vtanh.f32 %v154_v21  ;;  %v449_v23 = vmul.f32 -1.442695, %v154_v21 }
 0x107   : > { %515 = vpow2.f32 %v449_v23 }
 0x10b   : > { %v514_v22 = vpop.eup %513 }
 0x10c   : > { %177 = vrot.lane.b32.xlu0 %v514_v22, %s635_s19  ;;  %v85_v22 = vld [vmem:[%s763_s18 + $0x18] sm:$0xff] }
 0x10d   : > { %v516_v24 = vpop.eup %515  ;;  %447 = vmatmul.msk.f32.vlgmr.msra.gmra.mxu3 %vm86_vm0, %v85_v22 }
 0x10e   : > { %v158_v25 = vadd.f32 1.0, %v516_v24 }
 0x110   : > { %517 = vrcp.f32 %v158_v25  ;;  %v170_v31 = vand.u32 2147483648, %v158_v25  ;;  %vm164_vm3 = vweird.f32 %v158_v25  ;;  %v168_v32 = vand.u32 2147483647, %v158_v25 }
 0x112   : > { %v171_v34 = vor.u32 1.1754944e-38, %v170_v31  ;;  %vm169_vm5 = vcmp.eq.f32.partialorder %v168_v32, 8.507059e+37 }
 0x116   : > { %v518_v26 = vpop.eup %517 }
 0x117   : > { %v160_v27 = vmul.f32 %v518_v26, %v158_v25  ;;  %vm165_vm2 = vweird.f32 %v518_v26 }
 0x118   : > { %vm166_vm4 = vmor %vm164_vm3, %vm165_vm2  ;;  %vm419_vm3 = vcmask (%p73_p0), 15360  }
 0x119   : > { %v161_v28 = vsub.f32 1.0, %v160_v27 }
 0x11b   : > { %v162_v29 = vmul.f32 %v518_v26, %v161_v28 }
 0x11d   : > { %v163_v30 = vadd.f32 %v518_v26, %v162_v29  ;;  %v123_v29 = vadd.f32 %v717_v12, %v122_v47 }
 0x11f   : > { %v167_v33 = vsel %vm166_vm4, %v518_v26, %v163_v30 }
 0x120   : > { %v172_v36 = vsel %vm169_vm5, %v171_v34, %v167_v33 }
 0x121   : > { %v175_v38 = vmul.f32 %v620_v14, %v172_v36 }
 0x17e   : > { %v178_v35 = vpop.permute.xlu0 %177 }
 0x17f   : > { %v180_v37 = vmul.f32 %v178_v35, %v172_v36 }
 0x181   : > { %182 = vrot.lane.b32.xlu1 %v180_v37, %s634_s2 }
 0x190   : > { %v125_v28 = vpop.f32.mrf.mxu3 }
 0x1f3   : > { %v183_v39 = vpop.permute.xlu1 %182 }
 0x1f4   : > { %v185_v40 = vadd.f32 %v183_v39, %v175_v38 }
 0x1f6   : > { %519 = vtanh.f32 %v185_v40 }
 0x1fc   : > { %v520_v41 = vpop.eup %519 }
 0x1fd   : > { %188 = vrot.lane.b32.xlu1 %v520_v41, %s635_s19 }
 0x26f   : > { %v189_v43 = vpop.permute.xlu1 %188 }
 0x270   : > { %v191_v44 = vmul.f32 %v189_v43, %v172_v36 }
 0x272   : > { %194 = vrot.lane.b32.xlu2 %v191_v44, %s634_s2  ;;  %v192_v24 = vmax.f32 %v616_v13, %v191_v44 }
 0x2cc   : > { %v195_v46 = vpop.permute.xlu2 %194 }
 0x2cd   : > { %450 = vmatmul.msk.f32.vlgmr.msrb.gmra.mxu2 %vm131_vm1, %v195_v46 }
 0x350   : > { %v215_v50 = vpop.f32.mrf.mxu2 }
 0x351   : > { %v218_v51 = vadd.f32 %v215_v50, %v120_v49 }
 0x353   : > { %521 = vtanh.f32 %v218_v51  ;;  %v451_v53 = vmul.f32 -1.442695, %v218_v51 }
 0x355   : > { %523 = vpow2.f32 %v451_v53 }
 0x359   : > { %v522_v52 = vpop.eup %521 }
 0x35a   : > { %241 = vrot.lane.b32.xlu2 %v522_v52, %s635_s19 }
 0x35b   : > { %v524_v54 = vpop.eup %523 }
 0x35c   : > { %v222_v55 = vadd.f32 1.0, %v524_v54 }
 0x35e   : > { %525 = vrcp.f32 %v222_v55  ;;  %v234_v61 = vand.u32 2147483648, %v222_v55  ;;  %vm228_vm7 = vweird.f32 %v222_v55  ;;  %v232_v62 = vand.u32 2147483647, %v222_v55 }
 0x360   : > { %v235_v14 = vor.u32 1.1754944e-38, %v234_v61  ;;  %vm233_vm9 = vcmp.eq.f32.partialorder %v232_v62, 8.507059e+37 }
 0x364   : > { %v526_v56 = vpop.eup %525 }
 0x365   : > { %v224_v57 = vmul.f32 %v526_v56, %v222_v55  ;;  %vm229_vm6 = vweird.f32 %v526_v56  ;;  %v126_v55 = vadd.f32 %v717_v12, %v125_v28 }
 0x366   : > { %vm230_vm8 = vmor %vm228_vm7, %vm229_vm6 }
 0x367   : > { %v225_v58 = vsub.f32 1.0, %v224_v57 }
 0x369   : > { %v226_v59 = vmul.f32 %v526_v56, %v225_v58 }
 0x36b   : > { %v227_v60 = vadd.f32 %v526_v56, %v226_v59 }
 0x36d   : > { %v231_v63 = vsel %vm230_vm8, %v526_v56, %v227_v60 }
 0x36e   : > { %v236_v16 = vsel %vm233_vm9, %v235_v14, %v231_v63 }
 0x36f   : > { %v239_v18 = vmul.f32 %v236_v16, %v185_v40 }
 0x3b4   : > { %v242_v15 = vpop.permute.xlu2 %241 }
 0x3b5   : > { %v244_v17 = vmul.f32 %v242_v15, %v236_v16 }
 0x3b7   : > { %246 = vrot.lane.b32.xlu0 %v244_v17, %s634_s2 }
 0x429   : > { %v247_v19 = vpop.permute.xlu0 %246 }
 0x42a   : > { %v249_v20 = vadd.f32 %v247_v19, %v239_v18 }
 0x42c   : > { %527 = vtanh.f32 %v249_v20 }
 0x432   : > { %v528_v21 = vpop.eup %527 }
 0x433   : > { %252 = vrot.lane.b32.xlu1 %v528_v21, %s635_s19 }
 0x4a5   : > { %v253_v23 = vpop.permute.xlu1 %252 }
 0x4a6   : > { %v255_v25 = vmul.f32 %v253_v23, %v236_v16 }
 0x4a8   : > { %v802_v26 = vmax.f32 %v192_v24, %v255_v25  ;;  %258 = vrot.lane.b32.xlu2 %v255_v25, %s634_s2 }
 0x502   : > { %v259_v27 = vpop.permute.xlu2 %258 }
 0x503   : > { %452 = vmatmul.msk.f32.vlgmr.msrb.gmra.mxu3 %vm131_vm1, %v259_v27 }
 0x586   : > { %v279_v30 = vpop.f32.mrf.mxu3 }
 0x587   : > { %v282_v31 = vadd.f32 %v279_v30, %v123_v29  ;;  %v388_v29 = vld [vmem:[%s849_s4 + $0x18] sm:$0xff] (%p73_p0)  ;;  %v387_v30 = vld [vmem:[%s849_s4 + $0x10] sm:$0xff] (%p73_p0) }
 0x588   :  { %411 = vmatpush.msra.mxu0 (%p73_p0), %v388_v29 }
 0x589   : > { %529 = vtanh.f32 %v282_v31  ;;  %v453_v33 = vmul.f32 -1.442695, %v282_v31  ;;  %v386_v31 = vld [vmem:[%s849_s4 + $0x8] sm:$0xff] (%p73_p0) }
 0x58a   :  { %412 = vmatpush.msra.mxu0 (%p73_p0), %v387_v30 }
 0x58b   : > { %531 = vpow2.f32 %v453_v33 }
 0x58c   :  { %413 = vmatpush.msra.mxu0 (%p73_p0), %v386_v31 }
 0x58e   :  { %414 = vmatpush.msra.mxu0 (%p73_p0), %v385_v0 }
 0x58f   : > { %v530_v32 = vpop.eup %529 }
 0x590   : > { %305 = vrot.lane.b32.xlu0 %v530_v32, %s635_s19 }
 0x591   : > { %v532_v13 = vpop.eup %531 }
 0x592   : > { %v286_v34 = vadd.f32 1.0, %v532_v13 }
 0x594   : > { %533 = vrcp.f32 %v286_v34  ;;  %v298_v40 = vand.u32 2147483648, %v286_v34  ;;  %vm292_vm11 = vweird.f32 %v286_v34  ;;  %v296_v41 = vand.u32 2147483647, %v286_v34 }
 0x596   : > { %v299_v43 = vor.u32 1.1754944e-38, %v298_v40  ;;  %vm297_vm13 = vcmp.eq.f32.partialorder %v296_v41, 8.507059e+37 }
 0x59a   : > { %v534_v35 = vpop.eup %533 }
 0x59b   : > { %v288_v36 = vmul.f32 %v534_v35, %v286_v34  ;;  %vm293_vm10 = vweird.f32 %v534_v35 }
 0x59c   : > { %vm294_vm12 = vmor %vm292_vm11, %vm293_vm10 }
 0x59d   : > { %v289_v37 = vsub.f32 1.0, %v288_v36 }
 0x59f   : > { %v290_v38 = vmul.f32 %v534_v35, %v289_v37 }
 0x5a1   : > { %v291_v39 = vadd.f32 %v534_v35, %v290_v38 }
 0x5a3   : > { %v295_v42 = vsel %vm294_vm12, %v534_v35, %v291_v39 }
 0x5a4   : > { %v300_v45 = vsel %vm297_vm13, %v299_v43, %v295_v42 }
 0x5a5   : > { %v303_v47 = vmul.f32 %v300_v45, %v249_v20 }
 0x602   : > { %v306_v44 = vpop.permute.xlu0 %305 }
 0x603   : > { %v308_v46 = vmul.f32 %v306_v44, %v300_v45 }
 0x605   : > { %310 = vrot.lane.b32.xlu1 %v308_v46, %s634_s2 }
 0x677   : > { %v311_v48 = vpop.permute.xlu1 %310 }
 0x678   : > { %v313_v49 = vadd.f32 %v311_v48, %v303_v47 }
 0x67a   : > { %535 = vtanh.f32 %v313_v49 }
 0x680   : > { %v536_v50 = vpop.eup %535 }
 0x681   : > { %316 = vrot.lane.b32.xlu2 %v536_v50, %s635_s19 }
 0x6db   : > { %v317_v51 = vpop.permute.xlu2 %316 }
 0x6dc   : > { %v319_v52 = vmul.f32 %v317_v51, %v300_v45 }
 0x6de   : > { %v320_v53 = vmax.f32 %v802_v26, %v319_v52  ;;  %322 = vrot.lane.b32.xlu0 %v319_v52, %s634_s2 }
 0x750   : > { %v323_v54 = vpop.permute.xlu0 %322 }
 0x751   : > { %454 = vmatmul.msk.f32.vlgmr.msrb.gmra.mxu1 %vm131_vm1, %v323_v54 }
 0x7ce   : > { %v343_v56 = vpop.f32.mrf.mxu1 }
 0x7cf   : > { %v346_v57 = vadd.f32 %v343_v56, %v126_v55 }
 0x7d1   : > { %537 = vtanh.f32 %v346_v57  ;;  %v455_v59 = vmul.f32 -1.442695, %v346_v57 }
 0x7d3   : > { %539 = vpow2.f32 %v455_v59 }
 0x7d7   : > { %v538_v58 = vpop.eup %537 }
 0x7d8   : > { %369 = vrot.lane.b32.xlu1 %v538_v58, %s635_s19 }
 0x7d9   : > { %v540_v60 = vpop.eup %539 }
 0x7da   : > { %v350_v61 = vadd.f32 1.0, %v540_v60 }
 0x7dc   : > { %541 = vrcp.f32 %v350_v61  ;;  %v362_v17 = vand.u32 2147483648, %v350_v61  ;;  %vm356_vm15 = vweird.f32 %v350_v61  ;;  %v360_v18 = vand.u32 2147483647, %v350_v61 }
 0x7de   : > { %v363_v20 = vor.u32 1.1754944e-38, %v362_v17  ;;  %vm361_vm2 = vcmp.eq.f32.partialorder %v360_v18, 8.507059e+37 }
 0x7e2   : > { %v542_v62 = vpop.eup %541 }
 0x7e3   : > { %v352_v63 = vmul.f32 %v542_v62, %v350_v61  ;;  %vm357_vm14 = vweird.f32 %v542_v62 }
 0x7e4   : > { %vm358_vm0 = vmor %vm356_vm15, %vm357_vm14 }
 0x7e5   : > { %v353_v14 = vsub.f32 1.0, %v352_v63 }
 0x7e7   : > { %v354_v15 = vmul.f32 %v542_v62, %v353_v14 }
 0x7e9   : > { %v355_v16 = vadd.f32 %v542_v62, %v354_v15 }
 0x7eb   : > { %v359_v19 = vsel %vm358_vm0, %v542_v62, %v355_v16 }
 0x7ec   : > { %v364_v22 = vsel %vm361_vm2, %v363_v20, %v359_v19 }
 0x7ed   : > { %v367_v24 = vmul.f32 %v364_v22, %v313_v49 }
 0x84a   : > { %v370_v21 = vpop.permute.xlu1 %369 }
 0x84b   : > { %v372_v23 = vmul.f32 %v370_v21, %v364_v22 }
 0x84d   : > { %374 = vrot.lane.b32.xlu2 %v372_v23, %s634_s2 }
 0x8a7   : > { %v375_v25 = vpop.permute.xlu2 %374 }
 0x8a8   : > { %v377_v14 = vadd.f32 %v375_v25, %v367_v24  }
 0x8aa   : > { %543 = vtanh.f32 %v377_v14 }
 0x8b0   : > { %v544_v26 = vpop.eup %543 }
 0x8b1   : > { %380 = vrot.lane.b32.xlu0 %v544_v26, %s635_s19 }
 0x923   : > { %v381_v27 = vpop.permute.xlu0 %380 }
 0x924   : > { %v383_v15 = vmul.f32 %v381_v27, %v364_v22   ;;  %75 = sbr.rel (!%p73_p0) target bundleno = 16 (0x10), region = 60 }
 0x926   : > { %v384_v28 = vmax.f32 %v320_v53, %v383_v15  }
 0x928   : > { %v852_v13 = vmov %v384_v28  ;;  %394 = vrot.lane.b32.xlu0 (%p73_p0), %v384_v28, %s636_s24 }
 0x99a   :  { %v395_v1 = vpop.permute.xlu0 %394 }
 0x99b   :  { %456 = vmatmul.msk.f32.vlgmr.msra.gmra.mxu0 %vm131_vm1, %v395_v1 }
 0xa18   :  { %v416_v3 = vpop.f32.mrf.mxu0 }
 0xa19   :  { %v417_v4 = vadd.f32 %v545_v2, %v416_v3 }
 0xa1b   :  { %420 = vst.msk [vmem:[%s851_s6] sm:$0xff] %vm419_vm3, %v417_v4 }
 0xa1c   :  { %425 = vsyncpa [#allocation3], 1 }
 0xa1d   :  { %426 = vsyncpa [#allocation5], 1 }

</bundles_post_ra>
